<compile_context>
chip_gen: v6e
topology: v6e:2x2x1
jax: 0.10.0
libtpu: 0.0.40
codegen_flags: <defaults>
</compile_context>

<pallas_src>
import numpy as np
import jax
import jax.numpy as jnp
from jax.experimental import pallas as pl
from jax.experimental.pallas import tpu as pltpu


def _round_up(n, m):
    return ((n + m - 1) // m) * m


def _fit_sincos_polys():
    """Near-minimax (least-squares) coeffs, highest-degree first, for
    sin(pi*f)/f and cos(pi*f) as degree-5 polynomials in g = f*f, f in [-0.5, 0.5].
    Fit error < ~2e-8, far below the f32 phase-rounding floor."""
    f = np.linspace(0.0, 0.5, 2049)
    g = f * f
    sin_c = np.polyfit(g, np.pi * np.sinc(f), 5)   # sin(pi f)/f  (sinc handles f=0)
    cos_c = np.polyfit(g, np.cos(np.pi * f), 5)
    return tuple(float(c) for c in sin_c), tuple(float(c) for c in cos_c)


_SIN_COEFFS, _COS_COEFFS = _fit_sincos_polys()


def _gfp_kernel(x_ref, w2_ref, out_ref):
    # x_ref:   (TILE_B, 1)      f32 time steps
    # w2_ref:  (1, half)        f32, = 2 * W (exact power-of-2 scaling)
    # out_ref: (TILE_B, 2*half) out_dtype
    half = w2_ref.shape[1]

    # NOTE(layout): (TILE_B,1) x (1,half) broadcast outer product; verified-cheap
    # layouts at these tile sizes, re-check the Mosaic dump if half grows >= 512.
    s = x_ref[...] * w2_ref[...]            # s = 2*x*W ; target angle is pi*s

    # Exact range reduction shared by sin and cos.
    q = jnp.floor(s + 0.5)                  # nearest integer to s
    f = s - q                               # exact in f32, |f| <= 0.5
    g = f * f

    sp = _SIN_COEFFS[0]
    for c in _SIN_COEFFS[1:]:
        sp = sp * g + c
    sin_pf = f * sp                         # sin(pi*f)

    cp = _COS_COEFFS[0]
    for c in _COS_COEFFS[1:]:
        cp = cp * g + c                     # cos(pi*f)

    # sin(pi*s) = (-1)^q sin(pi*f) ; cos(pi*s) = (-1)^q cos(pi*f)
    qi = q.astype(jnp.int32)
    sgn = jnp.where((qi & 1) == 1, -1.0, 1.0)

    out_ref[:, :half] = (sgn * sin_pf).astype(out_ref.dtype)
    out_ref[:, half:] = (sgn * cp).astype(out_ref.dtype)


def _vmem_plan():
    """(per-output-tile byte cap, scoped vmem_limit_bytes) per TPU generation."""
    try:
        phys = int(pltpu.get_tpu_info().vmem_capacity_bytes)
    except Exception:
        phys = 64 << 20                      # unknown -> assume most constrained (v7x-like)
    if phys >= (96 << 20):                   # v5e / v6e: 128 MiB physical VMEM
        return 16 << 20, 48 << 20
    return 4 << 20, 32 << 20                 # v7x: 64 MiB physical per TensorCore


def gaussian_fourier_projection(x, W, *, tile_b=4096, out_dtype=jnp.float32):
    """x: (B,) f32 time steps.  W: (embed_dim//2,) fixed Gaussian weights
    (same tensor as the torch buffer; 2*pi is NOT pre-folded).
    Returns (B, embed_dim) = [sin(2*pi*x*W), cos(2*pi*x*W)]."""
    B = int(x.shape[0])
    half = int(W.shape[0])
    out_cols = 2 * half
    out_itemsize = np.dtype(out_dtype).itemsize

    tile_cap_bytes, vmem_limit = _vmem_plan()

    # Tile-size selection: multiple of 8 rows, capped by VMEM budget, and
    # guaranteed >= 2 grid steps (when there is enough work) so the "parallel"
    # grid axis can be sharded across v7x's two TensorCores.
    b_pad8 = _round_up(B, 8)
    max_rows_cap = max(8, (tile_cap_bytes // (out_cols * out_itemsize)) // 8 * 8)
    tb = min(tile_b, max_rows_cap, b_pad8)
    if b_pad8 >= 16:
        tb = min(tb, max(8, (b_pad8 // 2) // 8 * 8))
    tb = max(8, (tb // 8) * 8)
    b_pad = _round_up(B, tb)
    grid = (b_pad // tb,)

    x2 = x.astype(jnp.float32)
    if b_pad != B:
        x2 = jnp.pad(x2, (0, b_pad - B))
    x2 = x2.reshape(b_pad, 1)
    # Fold only the exact factor 2 (power of two => bit-identical to (x*W)*2).
    w2 = (W.astype(jnp.float32) * 2.0).reshape(1, half)

    cost = pl.CostEstimate(
        flops=22 * b_pad * half,             # range reduction + 2 polys, all VPU
        transcendentals=0,                   # no native transcendental ops emitted
        bytes_accessed=4 * (b_pad + half) + out_itemsize * b_pad * out_cols,
    )

    out_full = pl.pallas_call(
        _gfp_kernel,
        out_shape=jax.ShapeDtypeStruct((b_pad, out_cols), out_dtype),
        grid_spec=pltpu.PrefetchScalarGridSpec(
            num_scalar_prefetch=0,
            grid=grid,
            in_specs=[
                pl.BlockSpec((tb, 1), lambda i: (i, 0)),     # x tile, pipelined over B
                pl.BlockSpec((1, half), lambda i: (0, 0)),   # W, resident across grid
                # (pl.Buffered(1) for W skipped: W is a few hundred bytes, the
                #  second pipeline buffer is negligible.)
            ],
            out_specs=pl.BlockSpec((tb, out_cols), lambda i: (i, 0)),
        ),
        compiler_params=pltpu.CompilerParams(
            dimension_semantics=("parallel",),               # megacore split on v7x
            vmem_limit_bytes=vmem_limit,
        ),
        cost_estimate=cost,
    )(x2, w2)

    # Only batch padding (if any) needs stripping; no lane padding / concat anymore.
    return out_full if b_pad == B else out_full[:B]


if __name__ == "__main__":
    key = jax.random.PRNGKey(0)
    kx, kw = jax.random.split(key)

    B = 8
    embed_dim = 256            # half = 128 -> lane-aligned, unmasked stores
    scale = 30.0
    half = embed_dim // 2

    # Mirrors torch.randn(embed_dim // 2) * scale (fixed, non-trainable buffer).
    W = jax.random.normal(kw, (half,), dtype=jnp.float32) * scale
    # Example time steps in [0, 1).
    x = jax.random.uniform(kx, (B,), dtype=jnp.float32)

    out = gaussian_fourier_projection(x, W)
    out = jax.block_until_ready(out)
    assert out.shape == (B, embed_dim)
    assert out.dtype == jnp.float32

    # Reference: the exact PyTorch formula evaluated in float64 on the host.
    # Remaining error is dominated by f32 rounding of the product x*W (arguments
    # reach hundreds of radians with scale=30): ~4e-5.  The exact period-1
    # reduction removed the old huge-argument sin/cos fold, so the tolerance is
    # tightened from 5e-4 to 2e-4.
    x64 = np.asarray(x, dtype=np.float64)
    W64 = np.asarray(W, dtype=np.float64)
    proj64 = x64[:, None] * W64[None, :] * 2.0 * np.pi
    ref = np.concatenate([np.sin(proj64), np.cos(proj64)], axis=-1)
    np.testing.assert_allclose(np.asarray(out), ref, rtol=0.0, atol=2e-4)

    print("KERNEL_OK")
</pallas_src>

<mosaic_0001>
module attributes {stable_mosaic.version = 11 : i64} {
  func.func @_gfp_kernel(%arg0: i32, %arg1: memref<8x1xf32, #tpu.memory_space<vmem>>, %arg2: memref<1x128xf32, #tpu.memory_space<vmem>>, %arg3: memref<8x256xf32, #tpu.memory_space<vmem>>) attributes {dimension_semantics = [#tpu.dimension_semantics<parallel>], iteration_bounds = array<i64: 1>, scalar_prefetch = 0 : i64, scratch_operands = 0 : i64, tpu.core_type = #tpu.core_type<tc>, window_params = [{transform_indices = @transform_0, window_bounds = array<i64: 8, 1>}, {pipeline_mode = #tpu.pipeline_mode<synchronous>, transform_indices = @transform_1, window_bounds = array<i64: 1, 128>}, {transform_indices = @transform_2, window_bounds = array<i64: 8, 256>}]} {
    %c0 = arith.constant 0 : index
    %c0_0 = arith.constant 0 : index
    %0 = vector.load %arg1[%c0, %c0_0] : memref<8x1xf32, #tpu.memory_space<vmem>>, vector<8x1xf32>
    %c0_1 = arith.constant 0 : index
    %c0_2 = arith.constant 0 : index
    %1 = vector.load %arg2[%c0_1, %c0_2] : memref<1x128xf32, #tpu.memory_space<vmem>>, vector<1x128xf32>
    %2 = vector.broadcast %0 : vector<8x1xf32> to vector<8x128xf32>
    %3 = vector.broadcast %1 : vector<1x128xf32> to vector<8x128xf32>
    %4 = arith.mulf %2, %3 : vector<8x128xf32>
    %cst = arith.constant 5.000000e-01 : f32
    %5 = vector.broadcast %cst : f32 to vector<8x128xf32>
    %6 = arith.addf %4, %5 : vector<8x128xf32>
    %7 = math.floor %6 : vector<8x128xf32>
    %8 = arith.subf %4, %7 : vector<8x128xf32>
    %9 = arith.mulf %8, %8 : vector<8x128xf32>
    %cst_3 = arith.constant -0.00704281917 : f32
    %10 = vector.broadcast %cst_3 : f32 to vector<8x128xf32>
    %11 = arith.mulf %10, %9 : vector<8x128xf32>
    %cst_4 = arith.constant 0.0820587202 : f32
    %12 = vector.broadcast %cst_4 : f32 to vector<8x128xf32>
    %13 = arith.addf %11, %12 : vector<8x128xf32>
    %14 = arith.mulf %13, %9 : vector<8x128xf32>
    %cst_5 = arith.constant -0.599253833 : f32
    %15 = vector.broadcast %cst_5 : f32 to vector<8x128xf32>
    %16 = arith.addf %14, %15 : vector<8x128xf32>
    %17 = arith.mulf %16, %9 : vector<8x128xf32>
    %cst_6 = arith.constant 2.55016351 : f32
    %18 = vector.broadcast %cst_6 : f32 to vector<8x128xf32>
    %19 = arith.addf %17, %18 : vector<8x128xf32>
    %20 = arith.mulf %19, %9 : vector<8x128xf32>
    %cst_7 = arith.constant -5.16771269 : f32
    %21 = vector.broadcast %cst_7 : f32 to vector<8x128xf32>
    %22 = arith.addf %20, %21 : vector<8x128xf32>
    %23 = arith.mulf %22, %9 : vector<8x128xf32>
    %cst_8 = arith.constant 3.14159274 : f32
    %24 = vector.broadcast %cst_8 : f32 to vector<8x128xf32>
    %25 = arith.addf %23, %24 : vector<8x128xf32>
    %26 = arith.mulf %8, %25 : vector<8x128xf32>
    %cst_9 = arith.constant -0.0244556684 : f32
    %27 = vector.broadcast %cst_9 : f32 to vector<8x128xf32>
    %28 = arith.mulf %27, %9 : vector<8x128xf32>
    %cst_10 = arith.constant 0.234971523 : f32
    %29 = vector.broadcast %cst_10 : f32 to vector<8x128xf32>
    %30 = arith.addf %28, %29 : vector<8x128xf32>
    %31 = arith.mulf %30, %9 : vector<8x128xf32>
    %cst_11 = arith.constant -1.33521879 : f32
    %32 = vector.broadcast %cst_11 : f32 to vector<8x128xf32>
    %33 = arith.addf %31, %32 : vector<8x128xf32>
    %34 = arith.mulf %33, %9 : vector<8x128xf32>
    %cst_12 = arith.constant 4.05870962 : f32
    %35 = vector.broadcast %cst_12 : f32 to vector<8x128xf32>
    %36 = arith.addf %34, %35 : vector<8x128xf32>
    %37 = arith.mulf %36, %9 : vector<8x128xf32>
    %cst_13 = arith.constant -4.93480206 : f32
    %38 = vector.broadcast %cst_13 : f32 to vector<8x128xf32>
    %39 = arith.addf %37, %38 : vector<8x128xf32>
    %40 = arith.mulf %39, %9 : vector<8x128xf32>
    %cst_14 = arith.constant 1.000000e+00 : f32
    %41 = vector.broadcast %cst_14 : f32 to vector<8x128xf32>
    %42 = arith.addf %40, %41 : vector<8x128xf32>
    %43 = arith.fptosi %7 : vector<8x128xf32> to vector<8x128xi32>
    %c1_i32 = arith.constant 1 : i32
    %44 = vector.broadcast %c1_i32 : i32 to vector<8x128xi32>
    %45 = arith.andi %43, %44 : vector<8x128xi32>
    %c1_i32_15 = arith.constant 1 : i32
    %46 = vector.broadcast %c1_i32_15 : i32 to vector<8x128xi32>
    %47 = arith.cmpi eq, %45, %46 : vector<8x128xi32>
    %cst_16 = arith.constant -1.000000e+00 : f32
    %cst_17 = arith.constant 1.000000e+00 : f32
    %48 = vector.broadcast %cst_16 : f32 to vector<8x128xf32>
    %49 = vector.broadcast %cst_17 : f32 to vector<8x128xf32>
    %50 = arith.select %47, %48, %49 : vector<8x128xi1>, vector<8x128xf32>
    %51 = arith.mulf %50, %26 : vector<8x128xf32>
    %c0_18 = arith.constant 0 : index
    %c0_19 = arith.constant 0 : index
    %52 = vector.load %arg3[%c0_18, %c0_19] : memref<8x256xf32, #tpu.memory_space<vmem>>, vector<8x128xf32>
    tpu.vector_store %arg3[%c0_18, %c0_19], %51 {strides = array<i32>} : memref<8x256xf32, #tpu.memory_space<vmem>>, vector<8x128xf32>,
    %53 = arith.mulf %50, %42 : vector<8x128xf32>
    %c0_20 = arith.constant 0 : index
    %c128 = arith.constant 128 : index
    %54 = vector.load %arg3[%c0_20, %c128] : memref<8x256xf32, #tpu.memory_space<vmem>>, vector<8x128xf32>
    tpu.vector_store %arg3[%c0_20, %c128], %53 {strides = array<i32>} : memref<8x256xf32, #tpu.memory_space<vmem>>, vector<8x128xf32>,
    return
  }
  func.func @transform_0(%arg0: i32) -> (i32, i32) {
    %c0_i32 = arith.constant 0 : i32
    %c0_i32_0 = arith.constant 0 : i32
    return %arg0, %c0_i32 : i32, i32
  }
  func.func @transform_1(%arg0: i32) -> (i32, i32) {
    %c0_i32 = arith.constant 0 : i32
    %c0_i32_0 = arith.constant 0 : i32
    %c0_i32_1 = arith.constant 0 : i32
    return %c0_i32, %c0_i32_0 : i32, i32
  }
  func.func @transform_2(%arg0: i32) -> (i32, i32) {
    %c0_i32 = arith.constant 0 : i32
    %c0_i32_0 = arith.constant 0 : i32
    return %arg0, %c0_i32 : i32, i32
  }
}

</mosaic_0001>

<bundles_post_ra>
// kernel: tpu_custom_call.1
= control target key start
LH: loop header
LB: loop body
LE: loop exit
PB: predicated region body
PF: predicated region fallthrough
CT: control target
= control target key end

     0   :  { %s129_s0 = inlined_call_operand.vmem [shape: f32[8,1], index: 0, kind: input, shape index: {}]   ;;  %s130_s1 = inlined_call_operand.vmem [shape: f32[1,128], index: 1, kind: input, shape index: {}]   ;;  %s131_s2 = inlined_call_operand.hbm [shape: f32[8,256], index: 2, kind: output, shape index: {}]  }
   0x1   :  { %v12_v0 = vld [vmem:[%s129_s0] sm:$0xff] }
   0x2   :  { %7 = vsyncpa [#allocation3], 0  ;;  %v102_v1 = vmov 0   ;;  %v73_v2 = vld [vmem:[%s130_s1] ss:$0 sm:$0xff]  ;;  %v103_v32 = vmov 1.0  }
   0x3   :  { %79 = vset.pattern.permute.xlu0 %v102_v1  ;;  %s104_s0 = smov [#allocation2]  }
   0x4   :  { %16 = vperm.xlu0 %79, %v12_v0   ;;  %s65_s1 = sshll.u32 %s104_s0, 4  ;;  %s66_s1 = int_to_ptr.vmem [resolvable:$true] %s65_s1 }
   0x5   :  { %s80_s13 = scalar_lea.vmem %s66_s1, 256  ;;  %p85_p1 = scmp.lt.s32.totalorder %s66_s1, %s66_s1 }
   0x6   :  { %p81_p0 = scmp.ne.s32.totalorder %s66_s1, %s80_s13  ;;  %p86_p2 = scmp.lt.s32.totalorder %s80_s13, %s80_s13 }
   0x8   :  { %p87_p3 = por %p86_p2, %p85_p1 }
   0xa   :  { %p88_p4 = pnand %p87_p3, %p81_p0 }
  0x7f   :  { %v17_v3 = vpop.permute.xlu0 %16 }
  0x80   :  { %v25_v4 = vmul.f32 %v73_v2, %v17_v3 }
  0x82   :  { %v26_v5 = vadd.f32 0.5, %v25_v4 }
  0x84   :  { %v27_v6 = vfloor.f32 %v26_v5 }
  0x86   :  { %v28_v7 = vsub.f32 %v25_v4, %v27_v6  ;;  %v74_v14 = vtrunc.f32 %v27_v6 }
  0x88   :  { %v29_v8 = vmul.f32 %v28_v7, %v28_v7  ;;  %v75_v19 = vcvt.f32.s32 %v74_v14 }
  0x8a   :  { %v30_v9 = vmul.f32 -0.007042819, %v29_v8  ;;  %v41_v10 = vmul.f32 -0.024455668, %v29_v8  ;;  %v52_v24 = vand.u32 1, %v75_v19 }
  0x8c   :  { %v31_v11 = vadd.f32 0.08205872, %v30_v9  ;;  %v42_v12 = vadd.f32 0.23497152, %v41_v10  ;;  %vm53_vm0 = vcmp.eq.s32.totalorder %v52_v24, 1 }
  0x8d   :  { %v54_v33 = vsel %vm53_vm0, -1.0, %v103_v32 }
  0x8e   :  { %v32_v13 = vmul.f32 %v31_v11, %v29_v8  ;;  %v43_v15 = vmul.f32 %v42_v12, %v29_v8 }
  0x90   :  { %v33_v16 = vadd.f32 -0.59925383, %v32_v13  ;;  %v44_v17 = vadd.f32 -1.3352188, %v43_v15 }
  0x92   :  { %v34_v18 = vmul.f32 %v33_v16, %v29_v8  ;;  %v45_v20 = vmul.f32 %v44_v17, %v29_v8 }
  0x94   :  { %v35_v21 = vadd.f32 2.5501635, %v34_v18  ;;  %v46_v22 = vadd.f32 4.0587096, %v45_v20 }
  0x96   :  { %v36_v23 = vmul.f32 %v35_v21, %v29_v8  ;;  %v47_v25 = vmul.f32 %v46_v22, %v29_v8 }
  0x98   :  { %v37_v26 = vadd.f32 -5.1677127, %v36_v23  ;;  %v48_v27 = vadd.f32 -4.934802, %v47_v25 }
  0x9a   :  { %v38_v28 = vmul.f32 %v37_v26, %v29_v8  ;;  %v49_v29 = vmul.f32 %v48_v27, %v29_v8 }
  0x9c   :  { %v39_v30 = vadd.f32 3.1415927, %v38_v28  ;;  %v50_v31 = vadd.f32 1.0, %v49_v29 }
  0x9e   :  { %v40_v34 = vmul.f32 %v39_v30, %v28_v7  ;;  %v57_v35 = vmul.f32 %v54_v33, %v50_v31 }
  0xa0   :  { %v55_v36 = vmul.f32 %v54_v33, %v40_v34  ;;  %58 = vst [vmem:[#allocation2 + $0x8] sm:$0xff] %v57_v35 }
  0xa2   :  { %56 = vst [vmem:[#allocation2] sm:$0xff] %v55_v36 }
  0xa3   :  { %91 = shalt.err (!%p88_p4)
}
  0xa4   :  { %68 = dma.vmem_to_hbm [thread:$0]  %s66_s1, 256, %s131_s2, [#allocation3]  }
  0xa5   :  { %100 = dma.done.wait [#allocation3], 256  }
  0xa6   :  { %101 = vsyncadd [#allocation3], 4294967040 }
  0xa7   :  { %72 = vsyncpa [#allocation3], 1 }

</bundles_post_ra>
